<compile_context>
chip_gen: v5e
topology: v5e:2x2
jax: 0.10.0
libtpu: 0.0.40
codegen_flags: <defaults>
</compile_context>

<pallas_src>
import functools

import jax
import jax.numpy as jnp
import numpy as np
from jax.experimental import pallas as pl
from jax.experimental.pallas import tpu as pltpu


def _round_up(v, m):
    return ((v + m - 1) // m) * m


def _pad_dim(v):
    """Lane-dense padding: 128 fully feeds v5e's 4x128x128 MXU; dims already
    larger than 128 are rounded to 256 so v6e/v7x's 2x256x256 MXU runs
    full-width passes (tiny dims like c=4 are not over-padded)."""
    if v <= 128:
        return 128
    return _round_up(v, 256)


# -----------------------------------------------------------------------------
# Fused multi-layer GCN kernel: no grid, every operand whole-array VMEM
# resident (no double buffering, no pipeline prologue).
# -----------------------------------------------------------------------------
def fused_gcn_kernel(*refs, num_layers, padded_dims):
    """refs = (a_ref, x_ref, w_ref[0..L-1], b_ref[0..L-1], o_ref).

    a_ref : (Np, Np)        bf16  normalized adjacency (padded)
    x_ref : (Np, P0)        bf16  input features (padded)
    w_ref : (P_l, P_{l+1})  bf16  BN-folded weights (padded)
    b_ref : (1, P_{l+1})    f32   BN-folded biases (padded)
    o_ref : (Np, P_L)       f32   logits (padded)
    """
    a_ref = refs[0]
    x_ref = refs[1]
    w_refs = refs[2:2 + num_layers]
    b_refs = refs[2 + num_layers:2 + 2 * num_layers]
    o_ref = refs[2 + 2 * num_layers]

    h = x_ref[...]                                  # bf16 (Np, P0)
    for l in range(num_layers):
        p_in, p_out = padded_dims[l], padded_dims[l + 1]
        # Trace-time associativity choice on padded-dim FLOPs:
        #   aggregate first : Np^2*p_in + Np*p_in*p_out
        #   transform first : Np*p_in*p_out + Np^2*p_out
        # -> aggregate-first wins iff p_in < p_out (tie at 128-padded toy
        #    sizes, where a single ordering is emitted either way).
        if p_in < p_out:
            ah = jnp.dot(a_ref[...], h, preferred_element_type=jnp.float32)
            z = jnp.dot(ah.astype(jnp.bfloat16), w_refs[l][...],
                        preferred_element_type=jnp.float32)
        else:
            hw = jnp.dot(h, w_refs[l][...], preferred_element_type=jnp.float32)
            z = jnp.dot(a_ref[...], hw.astype(jnp.bfloat16),
                        preferred_element_type=jnp.float32)
        z = z + b_refs[l][...]                      # f32 bias on the VPU
        if l != num_layers - 1:
            # Padded node rows pick up bias+ReLU garbage here; harmless because
            # A_hat's padded columns are zero and padded output rows are
            # sliced off in the wrapper (document for any future tiled rewrite).
            h = jnp.maximum(z, 0.0).astype(jnp.bfloat16)   # bf16 feeds the MXU
        else:
            o_ref[...] = z


def fused_gcn_forward(a_hat, x, weights, biases):
    """Pad/cast in JAX glue, run one gridless pallas_call, slice result back."""
    N, d = x.shape
    num_layers = len(weights)
    dims = [d] + [w.shape[1] for w in weights]
    padded_dims = [_pad_dim(v) for v in dims]
    # Np is the lane dim of A_hat and the M/K dims of the NxN matmul.
    Np = _pad_dim(N)

    # Build padded operands directly in bf16 (no NpxNp f32 intermediate).
    a_pad = jnp.pad(a_hat.astype(jnp.bfloat16), ((0, Np - N), (0, Np - N)))
    x_pad = jnp.pad(x.astype(jnp.bfloat16),
                    ((0, Np - N), (0, padded_dims[0] - d)))
    w_pads, b_pads = [], []
    for l in range(num_layers):
        w_pads.append(jnp.pad(weights[l].astype(jnp.bfloat16),
                              ((0, padded_dims[l] - dims[l]),
                               (0, padded_dims[l + 1] - dims[l + 1]))))
        b_pads.append(jnp.pad(biases[l].astype(jnp.float32),
                              ((0, 0), (0, padded_dims[l + 1] - dims[l + 1]))))

    # Whole-array VMEM residency: no block_shape, no grid, no double buffering.
    vmem_spec = pl.BlockSpec(memory_space=pltpu.MemorySpace.VMEM)
    kernel = functools.partial(fused_gcn_kernel, num_layers=num_layers,
                               padded_dims=tuple(padded_dims))
    out_pad = pl.pallas_call(
        kernel,
        out_shape=jax.ShapeDtypeStruct((Np, padded_dims[-1]), jnp.float32),
        in_specs=[vmem_spec] * (2 + 2 * num_layers),
        out_specs=vmem_spec,
        compiler_params=pltpu.CompilerParams(
            # Above the 16/32 MiB default scoped limit on every generation,
            # below v7x's 64 MiB physical VMEM (leaves compiler headroom).
            vmem_limit_bytes=48 * 1024 * 1024),
    )(a_pad, x_pad, *w_pads, *b_pads)
    return out_pad[:N, :dims[-1]]


# -----------------------------------------------------------------------------
# JAX glue: adjacency normalization, BN folding, forward, reference
# -----------------------------------------------------------------------------
def build_normalized_adjacency(edge_index, num_nodes):
    """Dense A_hat = D^{-1/2} (A + I) D^{-1/2}."""
    # TODO(synk): sparse scatter-add message passing is densified here; a
    #             block-sparse Pallas path would use PrefetchScalarGridSpec.
    src, dst = edge_index[0], edge_index[1]
    a = jnp.zeros((num_nodes, num_nodes), jnp.float32)
    a = a.at[dst, src].set(1.0)                        # message flows src -> dst
    a = a + jnp.eye(num_nodes, dtype=jnp.float32)      # self loops
    deg = jnp.sum(a, axis=1)
    d_inv_sqrt = jnp.where(deg > 0, 1.0 / jnp.sqrt(deg), 0.0)
    return a * d_inv_sqrt[:, None] * d_inv_sqrt[None, :]


def fold_batchnorm(params, eps=1e-5):
    """Fold eval-mode BatchNorm1d into the preceding conv's W and b."""
    num_layers = len(params["weights"])
    weights, biases = [], []
    for l in range(num_layers):
        w, b = params["weights"][l], params["biases"][l]
        if l != num_layers - 1:
            s = params["bn_gamma"][l] * jax.lax.rsqrt(params["bn_var"][l] + eps)
            w = w * s                                   # scale output columns
            b = b * s + params["bn_beta"][l] - params["bn_mean"][l] * s
        weights.append(w)
        biases.append(b)
    return weights, biases


def oe_forward(x, edge_index, params):
    """OE.forward with the 'gcn' backbone (eval mode): logits = GCN(x, A)."""
    a_hat = build_normalized_adjacency(edge_index, x.shape[0])
    weights, biases = fold_batchnorm(params)
    return fused_gcn_forward(a_hat, x, weights, biases)


def init_params(key, d, hidden, c, num_layers):
    """Deterministic synthetic parameters (shapes match GCNConv / BatchNorm1d).

    BN running stats / affine params are made non-trivial so that the BN
    folding path is actually exercised by the correctness check.
    """
    keys = jax.random.split(key, 6 * num_layers)
    dims = [d] + [hidden] * (num_layers - 1) + [c]
    weights, biases = [], []
    bn_gamma, bn_beta, bn_mean, bn_var = [], [], [], []
    for l in range(num_layers):
        fan_in, fan_out = dims[l], dims[l + 1]
        scale = 1.0 / np.sqrt(fan_in)
        k = keys[6 * l:6 * l + 6]
        weights.append(scale * jax.random.normal(k[0], (fan_in, fan_out),
                                                 jnp.float32))
        biases.append(0.01 * jax.random.normal(k[1], (1, fan_out), jnp.float32))
        bn_gamma.append(1.0 + 0.1 * jax.random.normal(k[2], (1, fan_out),
                                                      jnp.float32))
        bn_beta.append(0.1 * jax.random.normal(k[3], (1, fan_out), jnp.float32))
        bn_mean.append(0.1 * jax.random.normal(k[4], (1, fan_out), jnp.float32))
        bn_var.append(0.5 + jax.random.uniform(k[5], (1, fan_out), jnp.float32))
    return dict(weights=weights, biases=biases, bn_gamma=bn_gamma,
                bn_beta=bn_beta, bn_mean=bn_mean, bn_var=bn_var)


def oe_forward_ref(x, edge_index, params):
    """Pure-JAX f32 reference (explicit BN, no folding, no bf16)."""
    a_hat = build_normalized_adjacency(edge_index, x.shape[0])
    h = x
    num_layers = len(params["weights"])
    eps = 1e-5
    for l in range(num_layers):
        h = a_hat @ (h @ params["weights"][l]) + params["biases"][l]
        if l != num_layers - 1:
            h = (h - params["bn_mean"][l]) * jax.lax.rsqrt(
                params["bn_var"][l] + eps) * params["bn_gamma"][l] \
                + params["bn_beta"][l]
            h = jnp.maximum(h, 0.0)
    return h


if __name__ == "__main__":
    # Small synthetic graph: N=8 nodes, d=16 input feats, hidden=32, c=4
    # classes, num_layers=2 (matches args.hidden_channels / args.num_layers).
    key = jax.random.PRNGKey(0)
    k_x, k_p = jax.random.split(key)

    N, d, hidden, c, num_layers = 8, 16, 32, 4, 2
    x = jax.random.normal(k_x, (N, d), jnp.float32)
    # Deterministic ring + a couple of chords (directed edges src -> dst).
    edge_index = jnp.array(
        [[0, 1, 2, 3, 4, 5, 6, 7, 0, 2],
         [1, 2, 3, 4, 5, 6, 7, 0, 4, 6]], dtype=jnp.int32)

    params = init_params(k_p, d, hidden, c, num_layers)

    logits = jax.block_until_ready(oe_forward(x, edge_index, params))
    ref = jax.block_until_ready(oe_forward_ref(x, edge_index, params))

    assert logits.shape == (N, c), logits.shape
    # bf16 MXU operands with f32 accumulation -> ~1% worst-case deviation.
    assert np.allclose(np.asarray(logits), np.asarray(ref),
                       rtol=2e-2, atol=2e-2), \
        np.max(np.abs(np.asarray(logits) - np.asarray(ref)))

    print("KERNEL_OK")
</pallas_src>

<mosaic_0001>
module attributes {stable_mosaic.version = 11 : i64} {
  func.func @fused_gcn_kernel(%arg0: memref<128x128xbf16, #tpu.memory_space<vmem>>, %arg1: memref<128x128xbf16, #tpu.memory_space<vmem>>, %arg2: memref<128x128xbf16, #tpu.memory_space<vmem>>, %arg3: memref<128x128xbf16, #tpu.memory_space<vmem>>, %arg4: memref<1x128xf32, #tpu.memory_space<vmem>>, %arg5: memref<1x128xf32, #tpu.memory_space<vmem>>, %arg6: memref<128x128xf32, #tpu.memory_space<vmem>>) attributes {dimension_semantics = [], scalar_prefetch = 0 : i64, scratch_operands = 0 : i64, tpu.core_type = #tpu.core_type<tc>} {
    %c0 = arith.constant 0 : index
    %c0_0 = arith.constant 0 : index
    %0 = vector.load %arg1[%c0, %c0_0] : memref<128x128xbf16, #tpu.memory_space<vmem>>, vector<128x128xbf16>
    %c0_1 = arith.constant 0 : index
    %c0_2 = arith.constant 0 : index
    %1 = vector.load %arg2[%c0_1, %c0_2] : memref<128x128xbf16, #tpu.memory_space<vmem>>, vector<128x128xbf16>
    %cst = arith.constant dense<0.000000e+00> : vector<128x128xf32>
    %2 = tpu.matmul %0, %1, %cst {dimension_numbers = #tpu.dot_dimension_numbers<[1], [0], [0], [1], [0, 0, 1, 1], [], []>} : vector<128x128xbf16>, vector<128x128xbf16>, vector<128x128xf32> -> vector<128x128xf32>
    %c0_3 = arith.constant 0 : index
    %c0_4 = arith.constant 0 : index
    %3 = vector.load %arg0[%c0_3, %c0_4] : memref<128x128xbf16, #tpu.memory_space<vmem>>, vector<128x128xbf16>
    %4 = arith.truncf %2 : vector<128x128xf32> to vector<128x128xbf16>
    %cst_5 = arith.constant dense<0.000000e+00> : vector<128x128xf32>
    %5 = tpu.matmul %3, %4, %cst_5 {dimension_numbers = #tpu.dot_dimension_numbers<[1], [0], [0], [1], [0, 0, 1, 1], [], []>} : vector<128x128xbf16>, vector<128x128xbf16>, vector<128x128xf32> -> vector<128x128xf32>
    %c0_6 = arith.constant 0 : index
    %c0_7 = arith.constant 0 : index
    %6 = vector.load %arg4[%c0_6, %c0_7] : memref<1x128xf32, #tpu.memory_space<vmem>>, vector<1x128xf32>
    %7 = vector.broadcast %6 : vector<1x128xf32> to vector<128x128xf32>
    %8 = arith.addf %5, %7 : vector<128x128xf32>
    %cst_8 = arith.constant 0.000000e+00 : f32
    %9 = vector.broadcast %cst_8 : f32 to vector<128x128xf32>
    %10 = arith.maximumf %8, %9 : vector<128x128xf32>
    %11 = arith.truncf %10 : vector<128x128xf32> to vector<128x128xbf16>
    %c0_9 = arith.constant 0 : index
    %c0_10 = arith.constant 0 : index
    %12 = vector.load %arg3[%c0_9, %c0_10] : memref<128x128xbf16, #tpu.memory_space<vmem>>, vector<128x128xbf16>
    %cst_11 = arith.constant dense<0.000000e+00> : vector<128x128xf32>
    %13 = tpu.matmul %11, %12, %cst_11 {dimension_numbers = #tpu.dot_dimension_numbers<[1], [0], [0], [1], [0, 0, 1, 1], [], []>} : vector<128x128xbf16>, vector<128x128xbf16>, vector<128x128xf32> -> vector<128x128xf32>
    %c0_12 = arith.constant 0 : index
    %c0_13 = arith.constant 0 : index
    %14 = vector.load %arg0[%c0_12, %c0_13] : memref<128x128xbf16, #tpu.memory_space<vmem>>, vector<128x128xbf16>
    %15 = arith.truncf %13 : vector<128x128xf32> to vector<128x128xbf16>
    %cst_14 = arith.constant dense<0.000000e+00> : vector<128x128xf32>
    %16 = tpu.matmul %14, %15, %cst_14 {dimension_numbers = #tpu.dot_dimension_numbers<[1], [0], [0], [1], [0, 0, 1, 1], [], []>} : vector<128x128xbf16>, vector<128x128xbf16>, vector<128x128xf32> -> vector<128x128xf32>
    %c0_15 = arith.constant 0 : index
    %c0_16 = arith.constant 0 : index
    %17 = vector.load %arg5[%c0_15, %c0_16] : memref<1x128xf32, #tpu.memory_space<vmem>>, vector<1x128xf32>
    %18 = vector.broadcast %17 : vector<1x128xf32> to vector<128x128xf32>
    %19 = arith.addf %16, %18 : vector<128x128xf32>
    %c0_17 = arith.constant 0 : index
    %c0_18 = arith.constant 0 : index
    %20 = vector.load %arg6[%c0_17, %c0_18] : memref<128x128xf32, #tpu.memory_space<vmem>>, vector<128x128xf32>
    tpu.vector_store %arg6[%c0_17, %c0_18], %19 {strides = array<i32>} : memref<128x128xf32, #tpu.memory_space<vmem>>, vector<128x128xf32>,
    return
  }
}

</mosaic_0001>

<bundles_post_ra>
// kernel: tpu_custom_call.1
= control target key start
LH: loop header
LB: loop body
LE: loop exit
PB: predicated region body
PF: predicated region fallthrough
CT: control target
= control target key end

     0   :  { %11 = vsyncpa [#allocation3], 0  ;;  %s1020_s0 = inlined_call_operand.hbm [shape: bf16[128,128], index: 0, kind: input, shape index: {}]   ;;  %s1021_s1 = inlined_call_operand.hbm [shape: bf16[128,128], index: 1, kind: input, shape index: {}]   ;;  %s1022_s2 = inlined_call_operand.hbm [shape: bf16[128,128], index: 2, kind: input, shape index: {}]   ;;  %s1023_s3 = inlined_call_operand.hbm [shape: bf16[128,128], index: 3, kind: input, shape index: {}]   ;;  %s1024_s4 = inlined_call_operand.vmem [shape: f32[1,128], index: 4, kind: input, shape index: {}]   ;;  %s1025_s5 = inlined_call_operand.vmem [shape: f32[1,128], index: 5, kind: input, shape index: {}]   ;;  %s1026_s6 = inlined_call_operand.hbm [shape: f32[128,128], index: 6, kind: output, shape index: {}]  }
   0x1   :  { %12 = vsyncpa [#allocation6], 0 }
   0x2   :  { %13 = vsyncpa [#allocation9], 0 }
   0x3   :  { %14 = vsyncpa [#allocation4], 0  ;;  %s32_s23 = sshll.u32 %s1021_s1, 4  ;;  %s923_s24 = smov [#allocation5]   ;;  %s33_s23 = int_to_ptr.hbm [resolvable:$true] %s32_s23 }
   0x4   :  { %s34_s25 = sshll.u32 %s923_s24, 4  ;;  %s19_s28 = sshll.u32 %s1020_s0, 4  ;;  %s35_s25 = int_to_ptr.vmem [resolvable:$true] %s34_s25  ;;  %s20_s28 = int_to_ptr.hbm [resolvable:$true] %s19_s28 }
   0x5   :  { %s924_s29 = smov 64   ;;  %s925_s30 = smov 4  }
   0x6   :  { %40 = dma.hbm_to_vmem [thread:$0]  %s33_s23, 1024, %s35_s25, [#allocation6], %s924_s29, %s924_s29, %s925_s30  }
   0x7   :  { %s926_s7 = smov [#allocation2]   ;;  %s45_s11 = sshll.u32 %s1022_s2, 4  ;;  %s46_s11 = int_to_ptr.hbm [resolvable:$true] %s45_s11 }
   0x8   :  { %s21_s8 = sshll.u32 %s926_s7, 4  ;;  %s58_s13 = sshll.u32 %s1023_s3, 4  ;;  %s22_s8 = int_to_ptr.vmem [resolvable:$true] %s21_s8  ;;  %s59_s13 = int_to_ptr.hbm [resolvable:$true] %s58_s13 }
   0x9   :  { %27 = dma.hbm_to_vmem [thread:$0]  %s20_s28, 1024, %s22_s8, [#allocation3], %s924_s29, %s924_s29, %s925_s30  }
   0xa   :  { %s927_s14 = smov [#allocation7]   ;;  %s928_s0 = smov [#allocation8]  }
   0xb   :  { %s47_s15 = sshll.u32 %s927_s14, 4  ;;  %s60_s16 = sshll.u32 %s928_s0, 4  ;;  %s48_s15 = int_to_ptr.vmem [resolvable:$true] %s47_s15  ;;  %s61_s16 = int_to_ptr.vmem [resolvable:$true] %s60_s16 }
   0xc   :  { %53 = dma.hbm_to_vmem [thread:$0]  %s46_s11, 1024, %s48_s15, [#allocation6], %s924_s29, %s924_s29, %s925_s30  }
   0xd   :  { %66 = dma.hbm_to_vmem [thread:$0]  %s59_s13, 1024, %s61_s16, [#allocation9], %s924_s29, %s924_s29, %s925_s30  }
   0xe   :  { %915 = dma.done.wait [#allocation3], 1024  }
   0xf   :  { %916 = vsyncadd [#allocation3], 4294966272 }
  0x10   :  { %917 = dma.done.wait [#allocation6], 2048  }
  0x11   :  { %918 = vsyncadd [#allocation6], 4294965248 }
  0x12   :  { %919 = dma.done.wait [#allocation9], 1024  }
  0x13   :  { %920 = vsyncadd [#allocation9], 4294966272  ;;  %v767_v0 = vld [vmem:[#allocation7 + $0x38] sm:$0xff]  ;;  %v766_v1 = vld [vmem:[#allocation7 + $0x30] sm:$0xff]  ;;  %s609_s21 = sshll.u32 %s1026_s6, 4  ;;  %s930_s22 = smov 128   ;;  %s610_s21 = int_to_ptr.hbm [resolvable:$true] %s609_s21 }
  0x14   :  { %215 = vmatpush.bf16.msra.mxu0 %v767_v0  ;;  %v765_v2 = vld [vmem:[#allocation7 + $0x28] sm:$0xff]  ;;  %v764_v3 = vld [vmem:[#allocation7 + $0x20] sm:$0xff]  ;;  %v763_v4 = vld [vmem:[#allocation7 + $0x18] sm:$0xff]  ;;  %s931_s23 = smov 8  }
  0x15   :  { %v762_v5 = vld [vmem:[#allocation7 + $0x10] sm:$0xff]  ;;  %v761_v6 = vld [vmem:[#allocation7 + $0x8] sm:$0xff]  ;;  %v760_v7 = vld [vmem:[#allocation7] sm:$0xff] }
  0x16   :  { %v752_v8 = vld [vmem:[#allocation5] sm:$0xff]  ;;  %v753_v9 = vld [vmem:[#allocation5 + $0x8] sm:$0xff]  ;;  %v754_v10 = vld [vmem:[#allocation5 + $0x10] sm:$0xff] }
  0x17   :  { %v755_v11 = vld [vmem:[#allocation5 + $0x18] sm:$0xff]  ;;  %v756_v12 = vld [vmem:[#allocation5 + $0x20] sm:$0xff]  ;;  %v757_v13 = vld [vmem:[#allocation5 + $0x28] sm:$0xff] }
  0x18   :  { %216 = vmatpush.bf16.msra.mxu0 %v766_v1  ;;  %v758_v14 = vld [vmem:[#allocation5 + $0x30] sm:$0xff]  ;;  %v759_v15 = vld [vmem:[#allocation5 + $0x38] sm:$0xff]  ;;  %v979_v40 = vld [vmem:[#allocation2] sm:$0xff] }
  0x19   :  { %v982_v41 = vld [vmem:[#allocation2 + $0x8] sm:$0xff]  ;;  %v985_v42 = vld [vmem:[#allocation2 + $0x10] sm:$0xff]  ;;  %v988_v43 = vld [vmem:[#allocation2 + $0x18] sm:$0xff] }
  0x1a   :  { %v991_v44 = vld [vmem:[#allocation2 + $0x20] sm:$0xff]  ;;  %v783_v45 = vld [vmem:[#allocation8 + $0x38] sm:$0xff]  ;;  %v994_v46 = vld [vmem:[#allocation2 + $0x28] sm:$0xff] }
  0x1b   :  { %477 = vmatpush.bf16.msra.mxu2 %v783_v45  ;;  %v782_v47 = vld [vmem:[#allocation8 + $0x30] sm:$0xff]  ;;  %v781_v48 = vld [vmem:[#allocation8 + $0x28] sm:$0xff]  ;;  %v780_v49 = vld [vmem:[#allocation8 + $0x20] sm:$0xff] }
  0x1c   :  { %217 = vmatpush.bf16.msra.mxu0 %v765_v2  ;;  %v779_v50 = vld [vmem:[#allocation8 + $0x18] sm:$0xff]  ;;  %v997_v51 = vld [vmem:[#allocation2 + $0x30] sm:$0xff]  ;;  %v777_v53 = vld [vmem:[#allocation8 + $0x8] sm:$0xff] }
  0x1d   :  { %v778_v52 = vld [vmem:[#allocation8 + $0x10] sm:$0xff]  ;;  %v776_v54 = vld [vmem:[#allocation8] sm:$0xff]  ;;  %v1000_v55 = vld [vmem:[#allocation2 + $0x38] sm:$0xff] }
  0x1e   :  { %v793_v57 = vld [vmem:[%s1024_s4] ss:$0 sm:$0xff] }
  0x1f   :  { %478 = vmatpush.bf16.msra.mxu2 %v782_v47 }
  0x20   :  { %218 = vmatpush.bf16.msra.mxu0 %v764_v3 }
  0x23   :  { %479 = vmatpush.bf16.msra.mxu2 %v781_v48 }
  0x24   :  { %219 = vmatpush.bf16.msra.mxu0 %v763_v4 }
  0x27   :  { %480 = vmatpush.bf16.msra.mxu2 %v780_v49 }
  0x28   :  { %220 = vmatpush.bf16.msra.mxu0 %v762_v5 }
  0x2b   :  { %481 = vmatpush.bf16.msra.mxu2 %v779_v50 }
  0x2c   :  { %221 = vmatpush.bf16.msra.mxu0 %v761_v6 }
  0x2f   :  { %482 = vmatpush.bf16.msra.mxu2 %v778_v52 }
  0x30   :  { %222 = vmatpush.bf16.msra.mxu0 %v760_v7 }
  0x33   :  { %223 = vmatmul.bf16.vlgmr.msra.gmra.mxu0 %v752_v8  ;;  %483 = vmatpush.bf16.msra.mxu2 %v777_v53 }
  0x37   :  { %484 = vmatpush.bf16.msra.mxu2 %v776_v54 }
  0x43   :  { %228 = vmatmul.bf16.gmra.mxu0 %v753_v9 }
  0x53   :  { %233 = vmatmul.bf16.gmra.mxu0 %v754_v10 }
  0x63   :  { %238 = vmatmul.bf16.gmra.mxu0 %v755_v11 }
  0x73   :  { %243 = vmatmul.bf16.gmra.mxu0 %v756_v12 }
  0x83   :  { %248 = vmatmul.bf16.gmra.mxu0 %v757_v13 }
  0x93   :  { %253 = vmatmul.bf16.gmra.mxu0 %v758_v14 }
  0xa3   :  { %258 = vmatmul.bf16.gmra.mxu0 %v759_v15 }
  0xb0   :  { %v224_v16 = vpop.f32.mrf.mxu0 }
  0xb8   :  { %v226_v17 = vpop.f32.mrf.mxu0 }
  0xb9   :  { %v280_v18 = vpack.c.bf16 %v226_v17, %v224_v16 }
  0xc0   :  { %v229_v19 = vpop.f32.mrf.mxu0 }
  0xc8   :  { %v231_v20 = vpop.f32.mrf.mxu0 }
  0xc9   :  { %v281_v21 = vpack.c.bf16 %v231_v20, %v229_v19 }
  0xd0   :  { %v234_v22 = vpop.f32.mrf.mxu0 }
  0xd8   :  { %v236_v23 = vpop.f32.mrf.mxu0 }
  0xd9   :  { %v282_v24 = vpack.c.bf16 %v236_v23, %v234_v22 }
  0xe0   :  { %v239_v25 = vpop.f32.mrf.mxu0 }
  0xe8   :  { %v241_v26 = vpop.f32.mrf.mxu0 }
  0xe9   :  { %v283_v27 = vpack.c.bf16 %v241_v26, %v239_v25 }
  0xf0   :  { %v244_v28 = vpop.f32.mrf.mxu0 }
  0xf8   :  { %v246_v29 = vpop.f32.mrf.mxu0 }
  0xf9   :  { %v284_v39 = vpack.c.bf16 %v246_v29, %v244_v28 }
 0x100   :  { %v249_v30 = vpop.f32.mrf.mxu0 }
 0x108   :  { %v251_v31 = vpop.f32.mrf.mxu0 }
 0x109   :  { %v285_v38 = vpack.c.bf16 %v251_v31, %v249_v30 }
 0x110   :  { %v254_v32 = vpop.f32.mrf.mxu0 }
 0x118   :  { %v256_v33 = vpop.f32.mrf.mxu0 }
 0x119   :  { %v286_v37 = vpack.c.bf16 %v256_v33, %v254_v32 }
 0x120   :  { %v259_v34 = vpop.f32.mrf.mxu0 }
 0x128   :  { %v261_v35 = vpop.f32.mrf.mxu0 }
 0x129   :  { %v287_v36 = vpack.c.bf16 %v261_v35, %v259_v34 }
 0x12b   :  { %340 = vmatpush.bf16.msra.mxu1 %v287_v36 }
 0x12f   :  { %341 = vmatpush.bf16.msra.mxu1 %v286_v37 }
 0x133   :  { %342 = vmatpush.bf16.msra.mxu1 %v285_v38 }
 0x137   :  { %343 = vmatpush.bf16.msra.mxu1 %v284_v39 }
 0x13b   :  { %344 = vmatpush.bf16.msra.mxu1 %v283_v27 }
 0x13f   :  { %345 = vmatpush.bf16.msra.mxu1 %v282_v24 }
 0x143   :  { %346 = vmatpush.bf16.msra.mxu1 %v281_v21 }
 0x147   :  { %347 = vmatpush.bf16.msra.mxu1 %v280_v18 }
 0x14a   :  { %348 = vmatmul.bf16.vlgmr.msra.gmra.mxu1 %v979_v40 }
 0x15a   :  { %353 = vmatmul.bf16.gmra.mxu1 %v982_v41 }
 0x16a   :  { %358 = vmatmul.bf16.gmra.mxu1 %v985_v42 }
 0x17a   :  { %363 = vmatmul.bf16.gmra.mxu1 %v988_v43 }
 0x18a   :  { %368 = vmatmul.bf16.gmra.mxu1 %v991_v44 }
 0x19a   :  { %373 = vmatmul.bf16.gmra.mxu1 %v994_v46 }
 0x1aa   :  { %378 = vmatmul.bf16.gmra.mxu1 %v997_v51 }
 0x1ba   :  { %383 = vmatmul.bf16.gmra.mxu1 %v1000_v55 }
 0x1c7   :  { %v349_v56 = vpop.f32.mrf.mxu1 }
 0x1c8   :  { %v350_v58 = vadd.f32 %v793_v57, %v349_v56 }
 0x1ca   :  { %v389_v61 = vmax.f32 %v350_v58, 0.0 }
 0x1cf   :  { %v351_v59 = vpop.f32.mrf.mxu1 }
 0x1d0   :  { %v352_v60 = vadd.f32 %v793_v57, %v351_v59 }
 0x1d2   :  { %v390_v62 = vmax.f32 %v352_v60, 0.0 }
 0x1d4   :  { %v405_v63 = vpack.c.bf16 %v390_v62, %v389_v61 }
 0x1d6   :  { %485 = vmatmul.bf16.vlgmr.msra.gmra.mxu2 %v405_v63 }
 0x1d7   :  { %v354_v0 = vpop.f32.mrf.mxu1 }
 0x1d8   :  { %v355_v1 = vadd.f32 %v793_v57, %v354_v0 }
 0x1da   :  { %v391_v4 = vmax.f32 %v355_v1, 0.0 }
 0x1df   :  { %v356_v2 = vpop.f32.mrf.mxu1 }
 0x1e0   :  { %v357_v3 = vadd.f32 %v793_v57, %v356_v2 }
 0x1e2   :  { %v392_v5 = vmax.f32 %v357_v3, 0.0 }
 0x1e4   :  { %v406_v6 = vpack.c.bf16 %v392_v5, %v391_v4 }
 0x1e6   :  { %490 = vmatmul.bf16.gmra.mxu2 %v406_v6 }
 0x1e7   :  { %v359_v7 = vpop.f32.mrf.mxu1 }
 0x1e8   :  { %v360_v8 = vadd.f32 %v793_v57, %v359_v7 }
 0x1ea   :  { %v393_v11 = vmax.f32 %v360_v8, 0.0 }
 0x1ef   :  { %v361_v9 = vpop.f32.mrf.mxu1 }
 0x1f0   :  { %v362_v10 = vadd.f32 %v793_v57, %v361_v9 }
 0x1f2   :  { %v394_v12 = vmax.f32 %v362_v10, 0.0 }
 0x1f4   :  { %v407_v13 = vpack.c.bf16 %v394_v12, %v393_v11 }
 0x1f6   :  { %495 = vmatmul.bf16.gmra.mxu2 %v407_v13 }
 0x1f7   :  { %v364_v14 = vpop.f32.mrf.mxu1 }
 0x1f8   :  { %v365_v15 = vadd.f32 %v793_v57, %v364_v14 }
 0x1fa   :  { %v395_v18 = vmax.f32 %v365_v15, 0.0 }
 0x1ff   :  { %v366_v16 = vpop.f32.mrf.mxu1 }
 0x200   :  { %v367_v17 = vadd.f32 %v793_v57, %v366_v16 }
 0x202   :  { %v396_v19 = vmax.f32 %v367_v17, 0.0  ;;  %v794_v17 = vld [vmem:[%s1025_s5] ss:$0 sm:$0xff]  ;;  %s929_s5 = smov [#allocation10]  }
 0x203   :  { %s607_s18 = sshll.u32 %s929_s5, 4  ;;  %s608_s18 = int_to_ptr.vmem [resolvable:$true] %s607_s18 }
 0x204   :  { %v408_v20 = vpack.c.bf16 %v396_v19, %v395_v18 }
 0x206   :  { %500 = vmatmul.bf16.gmra.mxu2 %v408_v20 }
 0x207   :  { %v369_v21 = vpop.f32.mrf.mxu1 }
 0x208   :  { %v370_v22 = vadd.f32 %v793_v57, %v369_v21 }
 0x20a   :  { %v397_v25 = vmax.f32 %v370_v22, 0.0 }
 0x20f   :  { %v371_v23 = vpop.f32.mrf.mxu1 }
 0x210   :  { %v372_v24 = vadd.f32 %v793_v57, %v371_v23 }
 0x212   :  { %v398_v26 = vmax.f32 %v372_v24, 0.0 }
 0x214   :  { %v409_v27 = vpack.c.bf16 %v398_v26, %v397_v25 }
 0x216   :  { %505 = vmatmul.bf16.gmra.mxu2 %v409_v27 }
 0x217   :  { %v374_v28 = vpop.f32.mrf.mxu1 }
 0x218   :  { %v375_v29 = vadd.f32 %v793_v57, %v374_v28 }
 0x21a   :  { %v399_v32 = vmax.f32 %v375_v29, 0.0 }
 0x21f   :  { %v376_v30 = vpop.f32.mrf.mxu1 }
 0x220   :  { %v377_v31 = vadd.f32 %v793_v57, %v376_v30 }
 0x222   :  { %v400_v33 = vmax.f32 %v377_v31, 0.0 }
 0x224   :  { %v410_v34 = vpack.c.bf16 %v400_v33, %v399_v32 }
 0x226   :  { %510 = vmatmul.bf16.gmra.mxu2 %v410_v34 }
 0x227   :  { %v379_v35 = vpop.f32.mrf.mxu1 }
 0x228   :  { %v380_v36 = vadd.f32 %v793_v57, %v379_v35 }
 0x22a   :  { %v401_v39 = vmax.f32 %v380_v36, 0.0 }
 0x22f   :  { %v381_v37 = vpop.f32.mrf.mxu1 }
 0x230   :  { %v382_v38 = vadd.f32 %v793_v57, %v381_v37 }
 0x232   :  { %v402_v45 = vmax.f32 %v382_v38, 0.0 }
 0x234   :  { %v411_v47 = vpack.c.bf16 %v402_v45, %v401_v39 }
 0x236   :  { %515 = vmatmul.bf16.gmra.mxu2 %v411_v47 }
 0x237   :  { %v384_v48 = vpop.f32.mrf.mxu1 }
 0x238   :  { %v385_v49 = vadd.f32 %v793_v57, %v384_v48 }
 0x23a   :  { %v403_v53 = vmax.f32 %v385_v49, 0.0 }
 0x23f   :  { %v386_v50 = vpop.f32.mrf.mxu1 }
 0x240   :  { %v387_v52 = vadd.f32 %v793_v57, %v386_v50 }
 0x242   :  { %v404_v54 = vmax.f32 %v387_v52, 0.0 }
 0x244   :  { %v412_v56 = vpack.c.bf16 %v404_v54, %v403_v53 }
 0x246   :  { %520 = vmatmul.bf16.gmra.mxu2 %v412_v56 }
 0x259   :  { %v486_v58 = vpop.f32.mrf.mxu2 }
 0x261   :  { %v488_v59 = vpop.f32.mrf.mxu2 }
 0x262   :  { %v526_v60 = vpack.c.bf16 %v488_v59, %v486_v58 }
 0x269   :  { %v491_v61 = vpop.f32.mrf.mxu2 }
 0x271   :  { %v493_v62 = vpop.f32.mrf.mxu2 }
 0x272   :  { %v527_v63 = vpack.c.bf16 %v493_v62, %v491_v61 }
 0x279   :  { %v496_v0 = vpop.f32.mrf.mxu2 }
 0x281   :  { %v498_v1 = vpop.f32.mrf.mxu2 }
 0x282   :  { %v528_v2 = vpack.c.bf16 %v498_v1, %v496_v0 }
 0x289   :  { %v501_v3 = vpop.f32.mrf.mxu2 }
 0x291   :  { %v503_v4 = vpop.f32.mrf.mxu2 }
 0x292   :  { %v529_v5 = vpack.c.bf16 %v503_v4, %v501_v3 }
 0x299   :  { %v506_v6 = vpop.f32.mrf.mxu2 }
 0x2a1   :  { %v508_v7 = vpop.f32.mrf.mxu2 }
 0x2a2   :  { %v530_v16 = vpack.c.bf16 %v508_v7, %v506_v6 }
 0x2a9   :  { %v511_v8 = vpop.f32.mrf.mxu2 }
 0x2b1   :  { %v513_v57 = vpop.f32.mrf.mxu2 }
 0x2b2   :  { %v531_v15 = vpack.c.bf16 %v513_v57, %v511_v8 }
 0x2b9   :  { %v516_v9 = vpop.f32.mrf.mxu2 }
 0x2c1   :  { %v518_v10 = vpop.f32.mrf.mxu2 }
 0x2c2   :  { %v532_v14 = vpack.c.bf16 %v518_v10, %v516_v9 }
 0x2c9   :  { %v521_v11 = vpop.f32.mrf.mxu2 }
 0x2d1   :  { %v523_v12 = vpop.f32.mrf.mxu2 }
 0x2d2   :  { %v533_v13 = vpack.c.bf16 %v523_v12, %v521_v11 }
 0x2d4   :  { %538 = vmatpush.bf16.msra.mxu3 %v533_v13 }
 0x2d8   :  { %539 = vmatpush.bf16.msra.mxu3 %v532_v14 }
 0x2dc   :  { %540 = vmatpush.bf16.msra.mxu3 %v531_v15 }
 0x2e0   :  { %541 = vmatpush.bf16.msra.mxu3 %v530_v16 }
 0x2e4   :  { %542 = vmatpush.bf16.msra.mxu3 %v529_v5 }
 0x2e8   :  { %543 = vmatpush.bf16.msra.mxu3 %v528_v2 }
 0x2ec   :  { %544 = vmatpush.bf16.msra.mxu3 %v527_v63 }
 0x2f0   :  { %545 = vmatpush.bf16.msra.mxu3 %v526_v60 }
 0x2f3   :  { %546 = vmatmul.bf16.vlgmr.msra.gmra.mxu3 %v979_v40 }
 0x303   :  { %551 = vmatmul.bf16.gmra.mxu3 %v982_v41 }
 0x313   :  { %556 = vmatmul.bf16.gmra.mxu3 %v985_v42 }
 0x323   :  { %561 = vmatmul.bf16.gmra.mxu3 %v988_v43 }
 0x333   :  { %566 = vmatmul.bf16.gmra.mxu3 %v991_v44 }
 0x343   :  { %571 = vmatmul.bf16.gmra.mxu3 %v994_v46 }
 0x353   :  { %576 = vmatmul.bf16.gmra.mxu3 %v997_v51 }
 0x363   :  { %581 = vmatmul.bf16.gmra.mxu3 %v1000_v55 }
 0x376   :  { %v547_v18 = vpop.f32.mrf.mxu3 }
 0x377   :  { %v548_v40 = vadd.f32 %v794_v17, %v547_v18 }
 0x379   :  { %587 = vst [vmem:[#allocation10] sm:$0xff] %v548_v40 }
 0x37e   :  { %v549_v41 = vpop.f32.mrf.mxu3 }
 0x37f   :  { %v550_v19 = vadd.f32 %v794_v17, %v549_v41 }
 0x381   :  { %588 = vst [vmem:[#allocation10 + $0x8] sm:$0xff] %v550_v19 }
 0x386   :  { %v552_v42 = vpop.f32.mrf.mxu3 }
 0x387   :  { %v553_v43 = vadd.f32 %v794_v17, %v552_v42 }
 0x389   :  { %589 = vst [vmem:[#allocation10 + $0x10] sm:$0xff] %v553_v43 }
 0x38e   :  { %v554_v44 = vpop.f32.mrf.mxu3 }
 0x38f   :  { %v555_v20 = vadd.f32 %v794_v17, %v554_v44 }
 0x391   :  { %590 = vst [vmem:[#allocation10 + $0x18] sm:$0xff] %v555_v20 }
 0x396   :  { %v557_v46 = vpop.f32.mrf.mxu3 }
 0x397   :  { %v558_v51 = vadd.f32 %v794_v17, %v557_v46 }
 0x399   :  { %591 = vst [vmem:[#allocation10 + $0x20] sm:$0xff] %v558_v51 }
 0x39e   :  { %v559_v55 = vpop.f32.mrf.mxu3 }
 0x39f   :  { %v560_v21 = vadd.f32 %v794_v17, %v559_v55 }
 0x3a1   :  { %592 = vst [vmem:[#allocation10 + $0x28] sm:$0xff] %v560_v21 }
 0x3a6   :  { %v562_v22 = vpop.f32.mrf.mxu3 }
 0x3a7   :  { %v563_v23 = vadd.f32 %v794_v17, %v562_v22 }
 0x3a9   :  { %593 = vst [vmem:[#allocation10 + $0x30] sm:$0xff] %v563_v23 }
 0x3ae   :  { %v564_v24 = vpop.f32.mrf.mxu3 }
 0x3af   :  { %v565_v25 = vadd.f32 %v794_v17, %v564_v24 }
 0x3b1   :  { %594 = vst [vmem:[#allocation10 + $0x38] sm:$0xff] %v565_v25 }
 0x3b6   :  { %v567_v26 = vpop.f32.mrf.mxu3 }
 0x3b7   :  { %v568_v27 = vadd.f32 %v794_v17, %v567_v26 }
 0x3b9   :  { %595 = vst [vmem:[#allocation10 + $0x40] sm:$0xff] %v568_v27 }
 0x3be   :  { %v569_v28 = vpop.f32.mrf.mxu3 }
 0x3bf   :  { %v570_v29 = vadd.f32 %v794_v17, %v569_v28 }
 0x3c1   :  { %596 = vst [vmem:[#allocation10 + $0x48] sm:$0xff] %v570_v29 }
 0x3c6   :  { %v572_v30 = vpop.f32.mrf.mxu3 }
 0x3c7   :  { %v573_v31 = vadd.f32 %v794_v17, %v572_v30 }
 0x3c9   :  { %597 = vst [vmem:[#allocation10 + $0x50] sm:$0xff] %v573_v31 }
 0x3ce   :  { %v574_v32 = vpop.f32.mrf.mxu3 }
 0x3cf   :  { %v575_v33 = vadd.f32 %v794_v17, %v574_v32 }
 0x3d1   :  { %598 = vst [vmem:[#allocation10 + $0x58] sm:$0xff] %v575_v33 }
 0x3d6   :  { %v577_v34 = vpop.f32.mrf.mxu3 }
 0x3d7   :  { %v578_v35 = vadd.f32 %v794_v17, %v577_v34 }
 0x3d9   :  { %599 = vst [vmem:[#allocation10 + $0x60] sm:$0xff] %v578_v35 }
 0x3de   :  { %v579_v36 = vpop.f32.mrf.mxu3 }
 0x3df   :  { %v580_v37 = vadd.f32 %v794_v17, %v579_v36 }
 0x3e1   :  { %600 = vst [vmem:[#allocation10 + $0x68] sm:$0xff] %v580_v37 }
 0x3e6   :  { %v582_v38 = vpop.f32.mrf.mxu3 }
 0x3e7   :  { %v583_v39 = vadd.f32 %v794_v17, %v582_v38 }
 0x3e9   :  { %601 = vst [vmem:[#allocation10 + $0x70] sm:$0xff] %v583_v39 }
 0x3ee   :  { %v584_v45 = vpop.f32.mrf.mxu3 }
 0x3ef   :  { %v585_v47 = vadd.f32 %v794_v17, %v584_v45 }
 0x3f1   :  { %602 = vst [vmem:[#allocation10 + $0x78] sm:$0xff] %v585_v47 }
 0x3f2   :  { %615 = dma.vmem_to_hbm [thread:$0]  %s608_s18, 2048, %s610_s21, [#allocation4], %s930_s22, %s930_s22, %s931_s23  }
 0x3f3   :  { %921 = dma.done.wait [#allocation4], 2048  }
 0x3f4   :  { %922 = vsyncadd [#allocation4], 4294965248 }
 0x3f5   :  { %620 = vsyncpa [#allocation3], 1 }
 0x3f6   :  { %621 = vsyncpa [#allocation6], 1 }
 0x3f7   :  { %622 = vsyncpa [#allocation9], 1 }
 0x3f8   :  { %623 = vsyncpa [#allocation4], 1 }

</bundles_post_ra>
